<compile_context>
chip_gen: v6e
topology: v6e:2x2x1
jax: 0.10.0
libtpu: 0.0.40
codegen_flags: <defaults>
</compile_context>

<pallas_src>
import math
from functools import partial

import jax
import jax.numpy as jnp
from jax.experimental import pallas as pl
from jax.experimental.pallas import tpu as pltpu

_LANE = 128
_INV_SQRT2 = 1.0 / math.sqrt(2.0)
_SQRT_2_OVER_PI = math.sqrt(2.0 / math.pi)


def _round_up(v, m):
    return (v + m - 1) // m * m


def _gelu(h, approximate):
    if approximate:
        # tanh approximation -> EUP slot, essentially free under MXU time
        return 0.5 * h * (1.0 + jnp.tanh(_SQRT_2_OVER_PI * (h + 0.044715 * h * h * h)))
    # exact (erf) GELU, matching torch nn.GELU() default semantics
    return 0.5 * h * (1.0 + jax.lax.erf(h * _INV_SQRT2))


# ---------------------------------------------------------------------------
# kernels
# ---------------------------------------------------------------------------
def _mlp_kernel_fused(x_ref, w1_ref, b1_ref, w2_ref, b2_ref, o_ref, *, approximate):
    # x_ref : (tm, C_in)     native dtype  -- streamed rows
    # w1_ref: (C_in, H_p)    bf16          -- resident (single-buffered)
    # b1_ref: (1, H_p)       f32           -- resident
    # w2_ref: (H_p, Cout_p)  bf16          -- resident
    # b2_ref: (1, Cout_p)    f32           -- resident
    x = x_ref[...].astype(w1_ref.dtype)        # in-kernel cast: VPU work hidden under MXU
    h = jnp.dot(x, w1_ref[...], preferred_element_type=jnp.float32) + b1_ref[...]
    h = _gelu(h, approximate)
    o = jnp.dot(h.astype(w2_ref.dtype), w2_ref[...],
                preferred_element_type=jnp.float32) + b2_ref[...]
    o_ref[...] = o.astype(o_ref.dtype)


def _mlp_kernel_hsplit(x_ref, w1_ref, b1_ref, w2_ref, b2_ref, o_ref, acc_ref, *,
                       approximate):
    # Reduction grid axis over the hidden dim H (streamed w1/w2 column/row blocks,
    # (tm, Cout_p) f32 accumulator in VMEM scratch).
    k = pl.program_id(1)

    @pl.when(k == 0)
    def _init():
        acc_ref[...] = jnp.zeros_like(acc_ref)

    x = x_ref[...].astype(w1_ref.dtype)
    h = jnp.dot(x, w1_ref[...], preferred_element_type=jnp.float32) + b1_ref[...]
    h = _gelu(h, approximate)
    acc_ref[...] += jnp.dot(h.astype(w2_ref.dtype), w2_ref[...],
                            preferred_element_type=jnp.float32)

    @pl.when(k == pl.num_programs(1) - 1)
    def _finalize():
        o_ref[...] = (acc_ref[...] + b2_ref[...]).astype(o_ref.dtype)


# ---------------------------------------------------------------------------
# parameter preparation (hoisted out of the per-call path)
# ---------------------------------------------------------------------------
def prepare_mlp_params(w1, b1, w2, b2, *, compute_dtype=jnp.bfloat16):
    """Pad H / C_out to 128-lane multiples and cast the weights ONCE; reuse per call."""
    c_in, hdim = w1.shape
    c_out = w2.shape[1]
    h_p = _round_up(hdim, _LANE)
    cout_p = _round_up(c_out, _LANE)
    w1p = jnp.pad(w1, ((0, 0), (0, h_p - hdim))).astype(compute_dtype)
    w2p = jnp.pad(w2, ((0, h_p - hdim), (0, cout_p - c_out))).astype(compute_dtype)
    b1p = jnp.pad(b1, (0, h_p - hdim)).astype(jnp.float32).reshape(1, h_p)
    b2p = jnp.pad(b2, (0, cout_p - c_out)).astype(jnp.float32).reshape(1, cout_p)
    return dict(w1=w1p, b1=b1p, w2=w2p, b2=b2p,
                in_features=int(c_in), hidden_features=int(hdim),
                out_features=int(c_out))


def _vmem_budget_bytes():
    """~75% of physical VMEM (leaves headroom for Mosaic scratch / semaphores)."""
    try:
        cap = int(pltpu.get_tpu_info().vmem_capacity_bytes)
        if cap > 0:
            return int(cap * 0.75)
    except Exception:
        pass
    return 48 * 1024 * 1024        # conservative fallback (v7x has 64 MiB per TC)


# ---------------------------------------------------------------------------
# wrapper
# ---------------------------------------------------------------------------
def mlp_pallas_prepared(x, params, *, out_dtype=None, approximate_gelu=False,
                        tile_m=None, force_hsplit=False):
    """Fused MLP forward with pre-padded / pre-cast parameters.

    x: (B, N, C_in).  Returns (B, N, C_out) in `out_dtype` (default x.dtype).
    """
    B, N, c_in = x.shape
    assert c_in == params["in_features"], "channel mismatch"
    w1p, b1p, w2p, b2p = params["w1"], params["b1"], params["w2"], params["b2"]
    h_p = w1p.shape[1]
    cout_p = w2p.shape[1]
    c_out = params["out_features"]
    out_dtype = x.dtype if out_dtype is None else jnp.dtype(out_dtype)

    M = B * N
    x2d = x.reshape(M, c_in)                      # no wrapper pad/cast of channels

    csize = jnp.dtype(w1p.dtype).itemsize
    xsize = jnp.dtype(x.dtype).itemsize
    osize = jnp.dtype(out_dtype).itemsize

    budget = _vmem_budget_bytes()
    reserve = 4 * 1024 * 1024                     # compiler scratch / semaphores
    weight_bytes = (c_in * h_p + h_p * cout_p) * csize + (h_p + cout_p) * 4

    use_hsplit = bool(force_hsplit) or (weight_bytes > 0.55 * (budget - reserve))

    # sublane pack for the streamed row tiles
    pack = 16 if (xsize == 2 or osize == 2) else 8

    def pick_tm(fixed_bytes, per_row_bytes):
        avail = budget - reserve - fixed_bytes
        tm = max(pack, min(1024, avail // max(per_row_bytes, 1)))
        if tile_m is not None:
            tm = min(tm, int(tile_m))
        # v7x megacore: give the parallel row axis at least 2 grid steps when possible
        if M >= 2 * pack:
            tm = min(tm, _round_up((M + 1) // 2, pack))
        tm = max(pack, (int(tm) // pack) * pack)
        return int(tm)

    cost = pl.CostEstimate(
        flops=2 * M * (c_in * h_p + h_p * cout_p),
        transcendentals=M * h_p,
        bytes_accessed=M * c_in * xsize + M * cout_p * osize + weight_bytes,
    )
    compiler_params = pltpu.CompilerParams

    if not use_hsplit:
        # -------------------- fused path: both weights resident in VMEM ----------
        per_row = (2 * c_in * xsize            # double-buffered x tile
                   + 2 * cout_p * osize        # double-buffered out tile
                   + h_p * 4 + h_p * csize     # f32 intermediate + its bf16 cast
                   + cout_p * 4)               # f32 result before output cast
        tm = pick_tm(weight_bytes, per_row)
        m_p = _round_up(M, tm)
        x2d_p = x2d if m_p == M else jnp.pad(x2d, ((0, m_p - M), (0, 0)))
        grid_m = m_p // tm

        def build(single_buffer_weights):
            res_kw = ({"pipeline_mode": pl.Buffered(1)}
                      if single_buffer_weights else {})
            grid_spec = pltpu.PrefetchScalarGridSpec(
                num_scalar_prefetch=0,
                grid=(grid_m,),
                in_specs=[
                    pl.BlockSpec((tm, c_in), lambda i: (i, 0)),               # x (streamed)
                    pl.BlockSpec((c_in, h_p), lambda i: (0, 0), **res_kw),    # w1 (resident)
                    pl.BlockSpec((1, h_p), lambda i: (0, 0), **res_kw),       # b1 (resident)
                    pl.BlockSpec((h_p, cout_p), lambda i: (0, 0), **res_kw),  # w2 (resident)
                    pl.BlockSpec((1, cout_p), lambda i: (0, 0), **res_kw),    # b2 (resident)
                ],
                out_specs=pl.BlockSpec((tm, cout_p), lambda i: (i, 0)),
            )
            return pl.pallas_call(
                partial(_mlp_kernel_fused, approximate=approximate_gelu),
                out_shape=jax.ShapeDtypeStruct((m_p, cout_p), out_dtype),
                grid_spec=grid_spec,
                compiler_params=compiler_params(
                    dimension_semantics=("parallel",),
                    vmem_limit_bytes=int(budget),
                ),
                cost_estimate=cost,
            )

        try:
            out2d = build(True)(x2d_p, w1p, b1p, w2p, b2p)
        except Exception:
            # runtime rejected single-buffered resident operands: fall back to default
            out2d = build(False)(x2d_p, w1p, b1p, w2p, b2p)

    else:
        # -------------------- H-split path: stream hidden-dim weight blocks ------
        tk = _LANE
        for cand in (1024, 512, 256):
            blk = 2 * (c_in * cand + cand * cout_p) * csize
            if h_p % cand == 0 and blk < 0.4 * (budget - reserve):
                tk = cand
                break
        fixed = (2 * (c_in * tk + tk * cout_p) * csize   # double-buffered w1/w2 blocks
                 + 2 * tk * 4 + 2 * cout_p * 4)          # b1 blocks + b2
        per_row = (2 * c_in * xsize + 2 * cout_p * osize
                   + tk * 4 + tk * csize                 # f32 partial h + bf16 cast
                   + 2 * cout_p * 4)                     # f32 accumulator + dot result
        tm = pick_tm(fixed, per_row)
        m_p = _round_up(M, tm)
        x2d_p = x2d if m_p == M else jnp.pad(x2d, ((0, m_p - M), (0, 0)))
        grid = (m_p // tm, h_p // tk)

        grid_spec = pltpu.PrefetchScalarGridSpec(
            num_scalar_prefetch=0,
            grid=grid,
            in_specs=[
                pl.BlockSpec((tm, c_in), lambda i, k: (i, 0)),       # x (constant over k)
                pl.BlockSpec((c_in, tk), lambda i, k: (0, k)),       # w1 column block
                pl.BlockSpec((1, tk), lambda i, k: (0, k)),          # b1 block
                pl.BlockSpec((tk, cout_p), lambda i, k: (k, 0)),     # w2 row block
                pl.BlockSpec((1, cout_p), lambda i, k: (0, 0)),      # b2
            ],
            out_specs=pl.BlockSpec((tm, cout_p), lambda i, k: (i, 0)),
            scratch_shapes=[pltpu.VMEM((tm, cout_p), jnp.float32)],
        )
        out2d = pl.pallas_call(
            partial(_mlp_kernel_hsplit, approximate=approximate_gelu),
            out_shape=jax.ShapeDtypeStruct((m_p, cout_p), out_dtype),
            grid_spec=grid_spec,
            compiler_params=compiler_params(
                dimension_semantics=("parallel", "arbitrary"),
                vmem_limit_bytes=int(budget),
            ),
            cost_estimate=cost,
        )(x2d_p, w1p, b1p, w2p, b2p)

    return out2d[:M, :c_out].reshape(B, N, c_out)


def mlp_pallas(x, w1, b1, w2, b2, *, compute_dtype=jnp.bfloat16, **kwargs):
    """Convenience wrapper (pads/casts the weights on every call; prefer
    prepare_mlp_params + mlp_pallas_prepared for repeated forward passes)."""
    params = prepare_mlp_params(w1, b1, w2, b2, compute_dtype=compute_dtype)
    return mlp_pallas_prepared(x, params, **kwargs)


def _init_linear(key, fan_in, fan_out, dtype=jnp.float32):
    """Deterministic init mimicking torch nn.Linear (uniform +/- 1/sqrt(fan_in))."""
    kw, kb = jax.random.split(key)
    bound = 1.0 / math.sqrt(fan_in)
    w = jax.random.uniform(kw, (fan_in, fan_out), dtype, -bound, bound)
    b = jax.random.uniform(kb, (fan_out,), dtype, -bound, bound)
    return w, b


if __name__ == "__main__":
    # Small shapes consistent with the module: tokens (B, N, C)
    B, N = 2, 8
    in_features, hidden_features, out_features = 32, 128, 32

    key = jax.random.PRNGKey(0)
    kx, k1, k2 = jax.random.split(key, 3)

    x = jax.random.normal(kx, (B, N, in_features), jnp.float32)
    w1, b1 = _init_linear(k1, in_features, hidden_features)
    w2, b2 = _init_linear(k2, hidden_features, out_features)

    # pad/cast the parameters once (hoisted out of the per-call path)
    params = prepare_mlp_params(w1, b1, w2, b2)

    y = jax.block_until_ready(mlp_pallas_prepared(x, params))
    assert y.shape == (B, N, out_features)

    # also exercise the H-split (large hidden dim) path at the small shape
    y_split = jax.block_until_ready(mlp_pallas_prepared(x, params, force_hsplit=True))
    assert y_split.shape == (B, N, out_features)

    hi = jax.lax.Precision.HIGHEST
    f32 = jnp.float32

    # Reference 1: same numerics as the kernel (bf16 operands, f32 accumulation)
    xq = x.reshape(-1, in_features).astype(jnp.bfloat16).astype(f32)
    w1q = w1.astype(jnp.bfloat16).astype(f32)
    w2q = w2.astype(jnp.bfloat16).astype(f32)
    h = jnp.dot(xq, w1q, precision=hi) + b1
    h = 0.5 * h * (1.0 + jax.lax.erf(h / math.sqrt(2.0)))
    hq = h.astype(jnp.bfloat16).astype(f32)
    y_ref_q = (jnp.dot(hq, w2q, precision=hi) + b2).reshape(B, N, out_features)
    assert jnp.allclose(y, y_ref_q, atol=5e-3, rtol=1e-2), \
        float(jnp.max(jnp.abs(y - y_ref_q)))
    assert jnp.allclose(y_split, y_ref_q, atol=5e-3, rtol=1e-2), \
        float(jnp.max(jnp.abs(y_split - y_ref_q)))

    # Reference 2: pure f32 torch-equivalent forward (loose check for the bf16 MXU path)
    hf = jnp.dot(x.reshape(-1, in_features), w1, precision=hi) + b1
    hf = 0.5 * hf * (1.0 + jax.lax.erf(hf / math.sqrt(2.0)))
    y_ref_f = (jnp.dot(hf, w2, precision=hi) + b2).reshape(B, N, out_features)
    assert jnp.allclose(y, y_ref_f, atol=3e-2, rtol=3e-2), \
        float(jnp.max(jnp.abs(y - y_ref_f)))

    print("KERNEL_OK")
</pallas_src>

<mosaic_0001>
module attributes {stable_mosaic.version = 11 : i64} {
  func.func @_mlp_kernel_fused(%arg0: i32, %arg1: memref<8x32xf32, #tpu.memory_space<vmem>>, %arg2: memref<32x128xbf16, #tpu.memory_space<vmem>>, %arg3: memref<1x128xf32, #tpu.memory_space<vmem>>, %arg4: memref<128x128xbf16, #tpu.memory_space<vmem>>, %arg5: memref<1x128xf32, #tpu.memory_space<vmem>>, %arg6: memref<8x128xf32, #tpu.memory_space<vmem>>) attributes {dimension_semantics = [#tpu.dimension_semantics<parallel>], iteration_bounds = array<i64: 2>, scalar_prefetch = 0 : i64, scratch_operands = 0 : i64, tpu.core_type = #tpu.core_type<tc>, window_params = [{transform_indices = @transform_0, window_bounds = array<i64: 8, 32>}, {pipeline_mode = #tpu.pipeline_mode<synchronous>, transform_indices = @transform_1, window_bounds = array<i64: 32, 128>}, {pipeline_mode = #tpu.pipeline_mode<synchronous>, transform_indices = @transform_2, window_bounds = array<i64: 1, 128>}, {pipeline_mode = #tpu.pipeline_mode<synchronous>, transform_indices = @transform_3, window_bounds = array<i64: 128, 128>}, {pipeline_mode = #tpu.pipeline_mode<synchronous>, transform_indices = @transform_4, window_bounds = array<i64: 1, 128>}, {transform_indices = @transform_5, window_bounds = array<i64: 8, 128>}]} {
    %c0 = arith.constant 0 : index
    %c0_0 = arith.constant 0 : index
    %0 = vector.load %arg1[%c0, %c0_0] : memref<8x32xf32, #tpu.memory_space<vmem>>, vector<8x32xf32>
    %1 = arith.truncf %0 : vector<8x32xf32> to vector<8x32xbf16>
    %c0_1 = arith.constant 0 : index
    %c0_2 = arith.constant 0 : index
    %2 = vector.load %arg2[%c0_1, %c0_2] : memref<32x128xbf16, #tpu.memory_space<vmem>>, vector<32x128xbf16>
    %cst = arith.constant dense<0.000000e+00> : vector<8x128xf32>
    %3 = tpu.matmul %1, %2, %cst {dimension_numbers = #tpu.dot_dimension_numbers<[1], [0], [0], [1], [0, 0, 1, 1], [], []>} : vector<8x32xbf16>, vector<32x128xbf16>, vector<8x128xf32> -> vector<8x128xf32>
    %c0_3 = arith.constant 0 : index
    %c0_4 = arith.constant 0 : index
    %4 = vector.load %arg3[%c0_3, %c0_4] : memref<1x128xf32, #tpu.memory_space<vmem>>, vector<1x128xf32>
    %5 = vector.broadcast %4 : vector<1x128xf32> to vector<8x128xf32>
    %6 = arith.addf %3, %5 : vector<8x128xf32>
    %cst_5 = arith.constant 5.000000e-01 : f32
    %7 = vector.broadcast %cst_5 : f32 to vector<8x128xf32>
    %8 = arith.mulf %7, %6 : vector<8x128xf32>
    %cst_6 = arith.constant 0.707106769 : f32
    %9 = vector.broadcast %cst_6 : f32 to vector<8x128xf32>
    %10 = arith.mulf %6, %9 : vector<8x128xf32>
    %11 = math.erf %10 : vector<8x128xf32>
    %cst_7 = arith.constant 1.000000e+00 : f32
    %12 = vector.broadcast %cst_7 : f32 to vector<8x128xf32>
    %13 = arith.addf %12, %11 : vector<8x128xf32>
    %14 = arith.mulf %8, %13 : vector<8x128xf32>
    %15 = arith.truncf %14 : vector<8x128xf32> to vector<8x128xbf16>
    %c0_8 = arith.constant 0 : index
    %c0_9 = arith.constant 0 : index
    %16 = vector.load %arg4[%c0_8, %c0_9] : memref<128x128xbf16, #tpu.memory_space<vmem>>, vector<128x128xbf16>
    %cst_10 = arith.constant dense<0.000000e+00> : vector<8x128xf32>
    %17 = tpu.matmul %15, %16, %cst_10 {dimension_numbers = #tpu.dot_dimension_numbers<[1], [0], [0], [1], [0, 0, 1, 1], [], []>} : vector<8x128xbf16>, vector<128x128xbf16>, vector<8x128xf32> -> vector<8x128xf32>
    %c0_11 = arith.constant 0 : index
    %c0_12 = arith.constant 0 : index
    %18 = vector.load %arg5[%c0_11, %c0_12] : memref<1x128xf32, #tpu.memory_space<vmem>>, vector<1x128xf32>
    %19 = vector.broadcast %18 : vector<1x128xf32> to vector<8x128xf32>
    %20 = arith.addf %17, %19 : vector<8x128xf32>
    %c0_13 = arith.constant 0 : index
    %c0_14 = arith.constant 0 : index
    %21 = vector.load %arg6[%c0_13, %c0_14] : memref<8x128xf32, #tpu.memory_space<vmem>>, vector<8x128xf32>
    tpu.vector_store %arg6[%c0_13, %c0_14], %20 {strides = array<i32>} : memref<8x128xf32, #tpu.memory_space<vmem>>, vector<8x128xf32>,
    return
  }
  func.func @transform_0(%arg0: i32) -> (i32, i32) {
    %c0_i32 = arith.constant 0 : i32
    %c0_i32_0 = arith.constant 0 : i32
    return %arg0, %c0_i32 : i32, i32
  }
  func.func @transform_1(%arg0: i32) -> (i32, i32) {
    %c0_i32 = arith.constant 0 : i32
    %c0_i32_0 = arith.constant 0 : i32
    %c0_i32_1 = arith.constant 0 : i32
    return %c0_i32, %c0_i32_0 : i32, i32
  }
  func.func @transform_2(%arg0: i32) -> (i32, i32) {
    %c0_i32 = arith.constant 0 : i32
    %c0_i32_0 = arith.constant 0 : i32
    %c0_i32_1 = arith.constant 0 : i32
    return %c0_i32, %c0_i32_0 : i32, i32
  }
  func.func @transform_3(%arg0: i32) -> (i32, i32) {
    %c0_i32 = arith.constant 0 : i32
    %c0_i32_0 = arith.constant 0 : i32
    %c0_i32_1 = arith.constant 0 : i32
    return %c0_i32, %c0_i32_0 : i32, i32
  }
  func.func @transform_4(%arg0: i32) -> (i32, i32) {
    %c0_i32 = arith.constant 0 : i32
    %c0_i32_0 = arith.constant 0 : i32
    %c0_i32_1 = arith.constant 0 : i32
    return %c0_i32, %c0_i32_0 : i32, i32
  }
  func.func @transform_5(%arg0: i32) -> (i32, i32) {
    %c0_i32 = arith.constant 0 : i32
    %c0_i32_0 = arith.constant 0 : i32
    return %arg0, %c0_i32 : i32, i32
  }
}

module attributes {stable_mosaic.version = 11 : i64} {
  func.func @_mlp_kernel_fused(%arg0: i32, %arg1: memref<8x32xf32, #tpu.memory_space<vmem>>, %arg2: memref<32x128xbf16, #tpu.memory_space<vmem>>, %arg3: memref<1x128xf32, #tpu.memory_space<vmem>>, %arg4: memref<128x128xbf16, #tpu.memory_space<vmem>>, %arg5: memref<1x128xf32, #tpu.memory_space<vmem>>, %arg6: memref<8x128xf32, #tpu.memory_space<vmem>>) attributes {dimension_semantics = [#tpu.dimension_semantics<parallel>], iteration_bounds = array<i64: 2>, scalar_prefetch = 0 : i64, scratch_operands = 0 : i64, tpu.core_type = #tpu.core_type<tc>, window_params = [{transform_indices = @transform_0, window_bounds = array<i64: 8, 32>}, {pipeline_mode = #tpu.pipeline_mode<synchronous>, transform_indices = @transform_1, window_bounds = array<i64: 32, 128>}, {pipeline_mode = #tpu.pipeline_mode<synchronous>, transform_indices = @transform_2, window_bounds = array<i64: 1, 128>}, {pipeline_mode = #tpu.pipeline_mode<synchronous>, transform_indices = @transform_3, window_bounds = array<i64: 128, 128>}, {pipeline_mode = #tpu.pipeline_mode<synchronous>, transform_indices = @transform_4, window_bounds = array<i64: 1, 128>}, {transform_indices = @transform_5, window_bounds = array<i64: 8, 128>}]} {
    %c0 = arith.constant 0 : index
    %c0_0 = arith.constant 0 : index
    %0 = vector.load %arg1[%c0, %c0_0] : memref<8x32xf32, #tpu.memory_space<vmem>>, vector<8x32xf32>
    %1 = arith.truncf %0 : vector<8x32xf32> to vector<8x32xbf16>
    %c0_1 = arith.constant 0 : index
    %c0_2 = arith.constant 0 : index
    %2 = vector.load %arg2[%c0_1, %c0_2] : memref<32x128xbf16, #tpu.memory_space<vmem>>, vector<32x128xbf16>
    %cst = arith.constant dense<0.000000e+00> : vector<8x128xf32>
    %3 = tpu.matmul %1, %2, %cst {dimension_numbers = #tpu.dot_dimension_numbers<[1], [0], [0], [1], [0, 0, 1, 1], [], []>} : vector<8x32xbf16>, vector<32x128xbf16>, vector<8x128xf32> -> vector<8x128xf32>
    %c0_3 = arith.constant 0 : index
    %c0_4 = arith.constant 0 : index
    %4 = vector.load %arg3[%c0_3, %c0_4] : memref<1x128xf32, #tpu.memory_space<vmem>>, vector<1x128xf32>
    %5 = vector.broadcast %4 : vector<1x128xf32> to vector<8x128xf32>
    %6 = arith.addf %3, %5 : vector<8x128xf32>
    %cst_5 = arith.constant 5.000000e-01 : f32
    %7 = vector.broadcast %cst_5 : f32 to vector<8x128xf32>
    %8 = arith.mulf %7, %6 : vector<8x128xf32>
    %cst_6 = arith.constant 0.707106769 : f32
    %9 = vector.broadcast %cst_6 : f32 to vector<8x128xf32>
    %10 = arith.mulf %6, %9 : vector<8x128xf32>
    %11 = math.erf %10 : vector<8x128xf32>
    %cst_7 = arith.constant 1.000000e+00 : f32
    %12 = vector.broadcast %cst_7 : f32 to vector<8x128xf32>
    %13 = arith.addf %12, %11 : vector<8x128xf32>
    %14 = arith.mulf %8, %13 : vector<8x128xf32>
    %15 = arith.truncf %14 : vector<8x128xf32> to vector<8x128xbf16>
    %c0_8 = arith.constant 0 : index
    %c0_9 = arith.constant 0 : index
    %16 = vector.load %arg4[%c0_8, %c0_9] : memref<128x128xbf16, #tpu.memory_space<vmem>>, vector<128x128xbf16>
    %cst_10 = arith.constant dense<0.000000e+00> : vector<8x128xf32>
    %17 = tpu.matmul %15, %16, %cst_10 {dimension_numbers = #tpu.dot_dimension_numbers<[1], [0], [0], [1], [0, 0, 1, 1], [], []>} : vector<8x128xbf16>, vector<128x128xbf16>, vector<8x128xf32> -> vector<8x128xf32>
    %c0_11 = arith.constant 0 : index
    %c0_12 = arith.constant 0 : index
    %18 = vector.load %arg5[%c0_11, %c0_12] : memref<1x128xf32, #tpu.memory_space<vmem>>, vector<1x128xf32>
    %19 = vector.broadcast %18 : vector<1x128xf32> to vector<8x128xf32>
    %20 = arith.addf %17, %19 : vector<8x128xf32>
    %c0_13 = arith.constant 0 : index
    %c0_14 = arith.constant 0 : index
    %21 = vector.load %arg6[%c0_13, %c0_14] : memref<8x128xf32, #tpu.memory_space<vmem>>, vector<8x128xf32>
    tpu.vector_store %arg6[%c0_13, %c0_14], %20 {strides = array<i32>} : memref<8x128xf32, #tpu.memory_space<vmem>>, vector<8x128xf32>,
    return
  }
  func.func @transform_0(%arg0: i32) -> (i32, i32) {
    %c0_i32 = arith.constant 0 : i32
    %c0_i32_0 = arith.constant 0 : i32
    return %arg0, %c0_i32 : i32, i32
  }
  func.func @transform_1(%arg0: i32) -> (i32, i32) {
    %c0_i32 = arith.constant 0 : i32
    %c0_i32_0 = arith.constant 0 : i32
    %c0_i32_1 = arith.constant 0 : i32
    return %c0_i32, %c0_i32_0 : i32, i32
  }
  func.func @transform_2(%arg0: i32) -> (i32, i32) {
    %c0_i32 = arith.constant 0 : i32
    %c0_i32_0 = arith.constant 0 : i32
    %c0_i32_1 = arith.constant 0 : i32
    return %c0_i32, %c0_i32_0 : i32, i32
  }
  func.func @transform_3(%arg0: i32) -> (i32, i32) {
    %c0_i32 = arith.constant 0 : i32
    %c0_i32_0 = arith.constant 0 : i32
    %c0_i32_1 = arith.constant 0 : i32
    return %c0_i32, %c0_i32_0 : i32, i32
  }
  func.func @transform_4(%arg0: i32) -> (i32, i32) {
    %c0_i32 = arith.constant 0 : i32
    %c0_i32_0 = arith.constant 0 : i32
    %c0_i32_1 = arith.constant 0 : i32
    return %c0_i32, %c0_i32_0 : i32, i32
  }
  func.func @transform_5(%arg0: i32) -> (i32, i32) {
    %c0_i32 = arith.constant 0 : i32
    %c0_i32_0 = arith.constant 0 : i32
    return %arg0, %c0_i32 : i32, i32
  }
}

</mosaic_0001>

<bundles_post_ra>
// kernel: tpu_custom_call.1
= control target key start
LH: loop header
LB: loop body
LE: loop exit
PB: predicated region body
PF: predicated region fallthrough
CT: control target
= control target key end

     0   :  { %10 = vsyncpa [#allocation3], 0  ;;  %s1087_s0 = inlined_call_operand.hbm [shape: f32[16,32], index: 0, kind: input, shape index: {}]   ;;  %s1088_s1 = inlined_call_operand.hbm [shape: bf16[32,128], index: 1, kind: input, shape index: {}]   ;;  %s1089_s2 = inlined_call_operand.vmem [shape: f32[1,128], index: 2, kind: input, shape index: {}]   ;;  %s1090_s3 = inlined_call_operand.hbm [shape: bf16[128,128], index: 3, kind: input, shape index: {}]   ;;  %s1091_s4 = inlined_call_operand.vmem [shape: f32[1,128], index: 4, kind: input, shape index: {}]   ;;  %s1092_s5 = inlined_call_operand.hbm [shape: f32[16,128], index: 5, kind: output, shape index: {}]  }
   0x1   :  { %12 = vsyncpa [#allocation3 + $0x1], 0 }
   0x2   :  { %13 = vsyncpa [#allocation6], 0 }
   0x3   :  { %14 = vsyncpa [#allocation4], 0 }
   0x4   :  { %16 = vsyncpa [#allocation4 + $0x1], 0  ;;  %s900_s18 = smov 0   ;;  %s902_s19 = smov 0  }
   0x5   :  { %s904_s20 = smov 0   ;;  %s906_s21 = smov 0  }
   0x6 LB: > { %s921_s22 = sadd.s32 4294967295, %s860_s21   ;;  %s560_s23 = sadd.s32 4294967294, %s860_s21   ;;  %s860_s21 = sphi %s906_s21, %s1114_s21   ;;  %s856_s20 = sphi %s904_s20, %s1113_s20   ;;  %s852_s19 = sphi %s902_s19, %s1112_s19   ;;  %s848_s18 = sphi %s900_s18, %s1111_s18  }
   0x7   : > { %p42_p0 = scmp.ne.s32.totalorder %s852_s19, %s848_s18  ;;  %p1093_p1 = scmp.eq.s32.totalorder %s921_s22, 0 }
   0x8   : > { %p156_p3 = scmp.eq.s32.totalorder %s560_s23, 1  ;;  %p561_p5 = scmp.ge.s32.totalorder %s860_s21, 1 }
   0x9   : > { %p930_p4 = por %p1093_p1, %p42_p0  ;;  %p163_p7 = scmp.lt.s32.totalorder %s860_s21, 3 }
   0xa   : > { %p935_p6 = por %p156_p3, %p42_p0  ;;  %s862_s27 = smov [#allocation5]  }
   0xb   : > { %s1097_s24 = scalar_select %p930_p4, 1, 0 }
   0xc   : > { %s1098_s25 = scalar_select %p935_p6, 1, 0 }
   0xd   : > { %p940_p8 = pnand %p561_p5, %p163_p7  ;;  %s175_s28 = sshll.u32 %s862_s27, 4  ;;  %s176_s28 = int_to_ptr.vmem [resolvable:$true] %s175_s28 }
   0xe   : > { %s863_s30 = smov [#allocation7]   ;;  %s723_s7 = scalar_lea.vmem %s176_s28, 256 }
   0xf   : > { %s1099_s26 = scalar_select %p940_p8, 1, 0 }
  0x10   : > { %p641_p9 = pneg %p940_p8  ;;  %s191_s6 = sshll.u32 %s863_s30, 4  ;;  %s192_s6 = int_to_ptr.vmem [resolvable:$true] %s191_s6 }
  0x11   : > { %p724_p13 = scmp.ne.s32.totalorder %s176_s28, %s723_s7  ;;  %p731_p5 = scmp.lt.s32.totalorder %s176_s28, %s176_s28 }
  0x12   : > { %p949_p11 = pnand %p641_p9, %p1093_p1  ;;  %p732_p7 = scmp.lt.s32.totalorder %s723_s7, %s723_s7 }
  0x14   : > { %p714_p12 = pneg %p949_p11  ;;  %p733_p10 = por %p732_p7, %p731_p5 }
  0x16   : > { %p726_p0 = pnand %p724_p13, %p714_p12 }
  0x18   : > { %p727_p3 = pneg %p726_p0 }
  0x1a   : > { %p734_p9 = pnand %p733_p10, %p727_p3 }
  0x1c   : > { %737 = shalt.err (!%p734_p9)
}
  0x1d   : > { %s864_s8 = smov 64   ;;  %s865_s9 = smov 4  }
  0x1e   : > { %644 = dma.hbm_to_vmem [thread:$0]  (!%p949_p11), %s1088_s1, 256, %s176_s28, [#allocation6], %s864_s8, %s864_s8, %s865_s9  }
  0x1f   : > { %s749_s12 = scalar_lea.vmem %s192_s6, 1024  ;;  %p757_p2 = scmp.lt.s32.totalorder %s192_s6, %s192_s6 }
  0x20   : > { %p750_p1 = scmp.ne.s32.totalorder %s192_s6, %s749_s12  ;;  %p758_p6 = scmp.lt.s32.totalorder %s749_s12, %s749_s12 }
  0x22   : > { %p752_p13 = pnand %p750_p1, %p714_p12  ;;  %p759_p5 = por %p758_p6, %p757_p2 }
  0x24   : > { %p753_p0 = pneg %p752_p13 }
  0x26   : > { %p760_p10 = pnand %p759_p5, %p753_p0 }
  0x28   : > { %763 = shalt.err (!%p760_p10)
}
  0x29   : > { %647 = dma.hbm_to_vmem [thread:$0]  (!%p949_p11), %s1090_s3, 1024, %s192_s6, [#allocation6], %s864_s8, %s864_s8, %s865_s9  }
  0x2a   : > { %s972_s15 = sadd.s32 1, %s860_s21   ;;  %s29_s16 = sadd.s32 1, %s856_s20 }
  0x2b   : > { %s26_s17 = ssub.s32 %s860_s21, %s972_s15  ;;  %p36_p1 = scmp.ne.s32.totalorder %s856_s20, %s852_s19 }
  0x2c   : > { %p27_p2 = scmp.eq.s32.totalorder %s26_s17, 0  ;;  %p37_p6 = scmp.eq.s32.totalorder %s860_s21, 0 }
  0x2d   : > { %p1101_p12 = scmp.eq.s32.totalorder %s921_s22, 1  ;;  %p658_p7 = scmp.lt.s32.totalorder %s860_s21, 2 }
  0x2e   : > { %s988_s27 = scalar_select %p27_p2, %s856_s20, %s29_s16  }
  0x2f   : > { %p982_p3 = por %p1101_p12, %p36_p1  ;;  %p38_p9 = por %p37_p6, %p36_p1 }
  0x30   : > { %s208_s28 = sand.u32 1, %s856_s20   ;;  %s566_s30 = sshll.u32 %s860_s21, 7 }
  0x31   : > { %s1102_s23 = scalar_select %p982_p3, 1, 0 }
  0x32   : > { %s565_s29 = sshll.u32 %s208_s28, 3  ;;  %s995_s8 = scalar_lea.hbm %s1087_s0, %s566_s30 }
  0x33   : > { %s212_s9 = scalar_lea.vmem [#allocation2], %s565_s29  ;;  %p997_p11 = pnand %p658_p7, %p38_p9 }
  0x34   : > { %s219_s10 = sshll.u32 %s212_s9, 4  ;;  %s209_s12 = scalar_lea.sflag [#allocation3], %s208_s28  ;;  %s220_s10 = int_to_ptr.vmem [resolvable:$true] %s219_s10 }
  0x35   : > { %s764_s13 = scalar_lea.hbm %s995_s8, 128  ;;  %p766_p0 = pneg %p997_p11 }
  0x36   : > { %p765_p13 = scmp.ne.s32.totalorder %s995_s8, %s764_s13  ;;  %s769_s17 = scalar_lea.hbm %s1087_s0, 256 }
  0x37   : > { %p770_p1 = scmp.lt.s32.totalorder %s995_s8, %s1087_s0  ;;  %p771_p2 = scmp.lt.s32.totalorder %s769_s17, %s764_s13 }
  0x38   : > { %p767_p5 = pnand %p766_p0, %p765_p13 }
  0x39   : > { %p772_p6 = por %p771_p2, %p770_p1 }
  0x3a   : > { %p768_p10 = pneg %p767_p5 }
  0x3c   : > { %p773_p12 = pnand %p772_p6, %p768_p10 }
  0x3e   : > { %776 = shalt.err (!%p773_p12)
}
  0x3f   : > { %s777_s6 = scalar_lea.vmem %s220_s10, 128  ;;  %s866_s28 = smov [#allocation2]  }
  0x40   : > { %p778_p7 = scmp.ne.s32.totalorder %s220_s10, %s777_s6  ;;  %s782_s7 = sshll.u32 %s866_s28, 4  ;;  %s783_s7 = int_to_ptr.vmem [resolvable:$false] %s782_s7 }
  0x41   : > { %s784_s9 = scalar_lea.vmem %s783_s7, 256  ;;  %p785_p13 = scmp.lt.s32.totalorder %s220_s10, %s783_s7 }
  0x42   : > { %p780_p9 = pnand %p778_p7, %p766_p0  ;;  %p786_p5 = scmp.lt.s32.totalorder %s784_s9, %s777_s6 }
  0x44   : > { %p781_p3 = pneg %p780_p9  ;;  %p787_p4 = por %p786_p5, %p785_p13 }
  0x46   : > { %p788_p8 = pnand %p787_p4, %p781_p3 }
  0x48   : > { %791 = shalt.err (!%p788_p8)
}
  0x49   : > { %651 = dma.hbm_to_vmem [thread:$0]  (!%p997_p11), %s995_s8, 128, %s220_s10, %s209_s12  }
  0x4a   : > { %p1104_p10 = scmp.ne.s32.totalorder %s1099_s26, 0 }
  0x4b   : > { %s1018_s13 = sand.u32 (!%p1104_p10), 1, %s852_s19   ;;  %p1105_p4 = scmp.ne.s32.totalorder (!%p1104_p10), %s1097_s24, 0 }
  0x4c   : > { %228 = sbr.rel (%p1104_p10) target bundleno = 521 (0x209), region = 40  ;;  %s568_s14 = sshll.u32 (!%p1104_p10), %s1018_s13, 3 }
  0x4d   : > { %s231_s16 = scalar_lea.sflag (!%p1104_p10), [#allocation3], %s1018_s13  ;;  %s234_s17 = scalar_lea.vmem (!%p1104_p10), [#allocation2], %s568_s14 }
  0x51   : > { %835 = dma.done.wait (%p1105_p4), %s231_s16, 128  }
  0x52   : > { %837 = vsyncadd (%p1105_p4), %s231_s16, 4294967168  ;;  %p1106_p8 = scmp.eq.s32.totalorder %s921_s22, 0 }
  0x54   : > { %839 = dma.done.wait (%p1106_p8), [#allocation6], 1280   ;;  %p1107_p3 = pmov %p1106_p8 }
  0x55   : > { %v867_v0 = vmov 0.0   ;;  %vm868_vm0 = vmmov 0   ;;  %v700_v1 = vld [vmem:[#allocation5 + $0x8] sm:$0xff]   ;;  %v701_v2 = vld [vmem:[#allocation5] sm:$0xff]   ;;  %v270_v3 = vld [vmem:[%s234_s17] sm:$0xff]  ;;  %vm295_vm1 = vcmask 261120  }
  0x56   : > { %841 = vsyncadd (%p1107_p3), [#allocation6], 4294966016  ;;  %601 = vmatprep.subr.bf16.mxu0 %v867_v0  ;;  %605 = vmatprep.mubr.msk.bf16.mxu0 %vm868_vm0, %v867_v0  ;;  %v702_v4 = vld [vmem:[#allocation7 + $0x38] sm:$0xff]   ;;  %v703_v5 = vld [vmem:[#allocation7 + $0x30] sm:$0xff]   ;;  %v271_v6 = vpack.c.bf16 %v270_v3, %v270_v3  ;;  %s586_s11 = sshll.u32 %s921_s22, 7  ;;  %s268_s12 = scalar_lea.vmem [#allocation8], %s568_s14 }
  0x57   : > { %609 = vmatprep.subr.bf16.mxu1 %v867_v0  ;;  %625 = vmatprep.mubr.msk.bf16.mxu1 %vm868_vm0, %v867_v0  ;;  %v704_v7 = vld [vmem:[#allocation7 + $0x28] sm:$0xff]   ;;  %v705_v8 = vld [vmem:[#allocation7 + $0x20] sm:$0xff]   ;;  %v706_v9 = vld [vmem:[#allocation7 + $0x18] sm:$0xff]   ;;  %s471_s30 = sshll.u32 %s268_s12, 4  ;;  %s1044_s28 = scalar_lea.hbm %s1092_s5, %s586_s11  ;;  %s1046_s30 = int_to_ptr.vmem [resolvable:$true] %s471_s30 }
  0x58   : > { %602 = vmatpush3.bf16.msra.mxu0 %v700_v1  ;;  %610 = vmatpush3.bf16.msra.mxu1 %v702_v4  ;;  %v707_v10 = vld [vmem:[#allocation7 + $0x10] sm:$0xff]   ;;  %v708_v11 = vld [vmem:[#allocation7 + $0x8] sm:$0xff]   ;;  %v709_v12 = vld [vmem:[#allocation7] sm:$0xff]   ;;  %s458_s7 = scalar_lea.sflag [#allocation4], %s1018_s13  ;;  %s792_s22 = scalar_lea.vmem %s1046_s30, 128 }
  0x59   : > { %603 = vmatprep.subr.bf16.mxu0 %v867_v0  ;;  %611 = vmatprep.subr.bf16.mxu1 %v867_v0  ;;  %v572_v13 = vld [vmem:[%s1089_s2] ss:$0 sm:$0xff]  ;;  %p793_p11 = scmp.ne.s32.totalorder %s1046_s30, %s792_s22  ;;  %p1108_p0 = scmp.ne.s32.totalorder %s1102_s23, 0 }
  0x5a   : > { %v576_v25 = vld [vmem:[%s1091_s4] ss:$0 sm:$0xff]  ;;  %s869_s9 = smov [#allocation8]  }
  0x5b   : > { %p794_p1 = pnand %p793_p11, %p1108_p0  ;;  %s796_s14 = sshll.u32 %s869_s9, 4  ;;  %s797_s14 = int_to_ptr.vmem [resolvable:$false] %s796_s14 }
  0x5c   : > { %604 = vmatpush3.bf16.msra.mxu0 %v701_v2  ;;  %612 = vmatpush3.bf16.msra.mxu1 %v703_v5  ;;  %s798_s16 = scalar_lea.vmem %s797_s14, 256  ;;  %p799_p6 = scmp.lt.s32.totalorder %s1046_s30, %s797_s14 }
  0x5d   : > { %613 = vmatprep.subr.bf16.mxu1 %v867_v0  ;;  %p795_p2 = pneg %p794_p1  ;;  %p800_p12 = scmp.lt.s32.totalorder %s798_s16, %s792_s22 }
  0x5f   : > { %606 = vmatmul.mubr.msk.bf16.vlgmr.msra.gmra.mxu0 %vm295_vm1, %v271_v6  ;;  %p801_p7 = por %p800_p12, %p799_p6 }
  0x60   : > { %614 = vmatpush3.bf16.msra.mxu1 %v704_v7 }
  0x61   : > { %615 = vmatprep.subr.bf16.mxu1 %v867_v0  ;;  %p802_p9 = pnand %p801_p7, %p795_p2 }
  0x64   : > { %616 = vmatpush3.bf16.msra.mxu1 %v705_v8 }
  0x65   : > { %617 = vmatprep.subr.bf16.mxu1 %v867_v0 }
  0x68   : > { %618 = vmatpush3.bf16.msra.mxu1 %v706_v9 }
  0x69   : > { %619 = vmatprep.subr.bf16.mxu1 %v867_v0 }
  0x6c   : > { %620 = vmatpush3.bf16.msra.mxu1 %v707_v10 }
  0x6d   : > { %621 = vmatprep.subr.bf16.mxu1 %v867_v0 }
  0x70   : > { %622 = vmatpush3.bf16.msra.mxu1 %v708_v11 }
  0x71   : > { %623 = vmatprep.subr.bf16.mxu1 %v867_v0 }
  0x74   : > { %624 = vmatpush3.bf16.msra.mxu1 %v709_v12 }
 0x11f   : > { %v333_v14 = vpop.f32.mrf.mxu0 }
 0x120   : > { %v334_v15 = vadd.f32 %v572_v13, %v333_v14 }
 0x121   : > { %v607_v16 = vpop.f32.mrf.mxu0 }
 0x122   : > { %v340_v17 = vmul.f32 0.70710677, %v334_v15  ;;  %v339_v21 = vmul.f32 0.5, %v334_v15 }
 0x123   : > { %v336_v18 = vpop.f32.mrf.mxu0 }
 0x124   : > { %710 = verf.f32 %v340_v17 }
 0x125   : > { %v608_v19 = vpop.f32.mrf.mxu0 }
 0x131   : > { %v711_v20 = vpop.eup %710 }
 0x132   : > { %v342_v22 = vadd.f32 1.0, %v711_v20 }
 0x134   : > { %v343_v23 = vmul.f32 %v342_v22, %v339_v21 }
 0x136   : > { %v344_v24 = vpack.c.bf16 %v343_v23, %v343_v23 }
 0x138   : > { %626 = vmatmul.mubr.bf16.vlgmr.msra.gmra.mxu1 %v344_v24 }
 0x1f8   : > { %v450_v26 = vpop.f32.mrf.mxu1 }
 0x1f9   : > { %v451_v27 = vadd.f32 %v576_v25, %v450_v26 }
 0x1fa   : > { %v627_v28 = vpop.f32.mrf.mxu1 }
 0x1fb   : > { %456 = vst [vmem:[%s268_s12] sm:$0xff] %v451_v27 }
 0x1fc   : > { %v453_v29 = vpop.f32.mrf.mxu1 }
 0x1fd   : > { %805 = shalt.err (!%p802_p9)
}
 0x1fe   : > { %s806_s17 = scalar_lea.hbm %s1044_s28, 128  ;;  %s810_s26 = scalar_lea.hbm %s1092_s5, 256 }
 0x1ff   : > { %p807_p13 = scmp.ne.s32.totalorder %s1044_s28, %s806_s17  ;;  %p811_p4 = scmp.lt.s32.totalorder %s1044_s28, %s1092_s5 }
 0x200   : > { %p812_p8 = scmp.lt.s32.totalorder %s810_s26, %s806_s17 }
 0x201   : > { %p808_p5 = pnand %p807_p13, %p1108_p0 }
 0x202   : > { %p813_p3 = por %p812_p8, %p811_p4 }
 0x203   : > { %p809_p10 = pneg %p808_p5 }
 0x205   : > { %p814_p11 = pnand %p813_p3, %p809_p10 }
 0x207   : > { %817 = shalt.err (!%p814_p11)
}
 0x208   : > { %639 = dma.vmem_to_hbm [thread:$0]  (%p1108_p0), %s1046_s30, 128, %s1044_s28, %s458_s7   ;;  %v628_v30 = vpop.f32.mrf.mxu1 }
 0x209 PF: > { %s483_s11 = sand.u32 1, %s848_s18   ;;  %p1109_p1 = scmp.ne.s32.totalorder %s1098_s25, 0 }
 0x20a   : > { %p1110_p2 = scmp.ge.s32.totalorder %s860_s21, 2  ;;  %s484_s12 = scalar_lea.sflag [#allocation4], %s483_s11 }
 0x20c   : > { %p653_p6 = pnand %p1110_p2, %p1109_p1 }
 0x20e   : > { %p654_p12 = pneg %p653_p6 }
 0x210   : > { %843 = dma.done.wait (%p654_p12), %s484_s12, 128  }
 0x211   : > { %845 = vsyncadd (%p654_p12), %s484_s12, 4294967168  ;;  %p19_p7 = scmp.ge.s32.totalorder %s972_s15, 4   ;;  %s1111_s18 = smov %s852_s19 }
 0x212   : > { %s1112_s19 = smov %s856_s20  ;;  %s1113_s20 = smov %s988_s27 }
 0x213   : > { %s1114_s21 = smov %s972_s15  ;;  %21 = sbr.rel (!%p19_p7) target bundleno = 6 (0x6), region = 93 }
 0x218   :  { %489 = vsyncpa [#allocation3], 1 }
 0x219   :  { %491 = vsyncpa [#allocation3 + $0x1], 1 }
 0x21a   :  { %492 = vsyncpa [#allocation6], 1 }
 0x21b   :  { %493 = vsyncpa [#allocation4], 1 }
 0x21c   :  { %495 = vsyncpa [#allocation4 + $0x1], 1 }

// kernel: tpu_custom_call.1
= control target key start
LH: loop header
LB: loop body
LE: loop exit
PB: predicated region body
PF: predicated region fallthrough
CT: control target
= control target key end

     0   :  { %10 = vsyncpa [#allocation3], 0  ;;  %s1087_s0 = inlined_call_operand.hbm [shape: f32[16,32], index: 0, kind: input, shape index: {}]   ;;  %s1088_s1 = inlined_call_operand.hbm [shape: bf16[32,128], index: 1, kind: input, shape index: {}]   ;;  %s1089_s2 = inlined_call_operand.vmem [shape: f32[1,128], index: 2, kind: input, shape index: {}]   ;;  %s1090_s3 = inlined_call_operand.hbm [shape: bf16[128,128], index: 3, kind: input, shape index: {}]   ;;  %s1091_s4 = inlined_call_operand.vmem [shape: f32[1,128], index: 4, kind: input, shape index: {}]   ;;  %s1092_s5 = inlined_call_operand.hbm [shape: f32[16,128], index: 5, kind: output, shape index: {}]  }
   0x1   :  { %12 = vsyncpa [#allocation3 + $0x1], 0 }
   0x2   :  { %13 = vsyncpa [#allocation6], 0 }
   0x3   :  { %14 = vsyncpa [#allocation4], 0 }
   0x4   :  { %16 = vsyncpa [#allocation4 + $0x1], 0  ;;  %s900_s18 = smov 0   ;;  %s902_s19 = smov 0  }
   0x5   :  { %s904_s20 = smov 0   ;;  %s906_s21 = smov 0  }
   0x6 LB: > { %s921_s22 = sadd.s32 4294967295, %s860_s21   ;;  %s560_s23 = sadd.s32 4294967294, %s860_s21   ;;  %s860_s21 = sphi %s906_s21, %s1114_s21   ;;  %s856_s20 = sphi %s904_s20, %s1113_s20   ;;  %s852_s19 = sphi %s902_s19, %s1112_s19   ;;  %s848_s18 = sphi %s900_s18, %s1111_s18  }
   0x7   : > { %p42_p0 = scmp.ne.s32.totalorder %s852_s19, %s848_s18  ;;  %p1093_p1 = scmp.eq.s32.totalorder %s921_s22, 0 }
   0x8   : > { %p156_p3 = scmp.eq.s32.totalorder %s560_s23, 1  ;;  %p561_p5 = scmp.ge.s32.totalorder %s860_s21, 1 }
   0x9   : > { %p930_p4 = por %p1093_p1, %p42_p0  ;;  %p163_p7 = scmp.lt.s32.totalorder %s860_s21, 3 }
   0xa   : > { %p935_p6 = por %p156_p3, %p42_p0  ;;  %s862_s27 = smov [#allocation5]  }
   0xb   : > { %s1097_s24 = scalar_select %p930_p4, 1, 0 }
   0xc   : > { %s1098_s25 = scalar_select %p935_p6, 1, 0 }
   0xd   : > { %p940_p8 = pnand %p561_p5, %p163_p7  ;;  %s175_s28 = sshll.u32 %s862_s27, 4  ;;  %s176_s28 = int_to_ptr.vmem [resolvable:$true] %s175_s28 }
   0xe   : > { %s863_s30 = smov [#allocation7]   ;;  %s723_s7 = scalar_lea.vmem %s176_s28, 256 }
   0xf   : > { %s1099_s26 = scalar_select %p940_p8, 1, 0 }
  0x10   : > { %p641_p9 = pneg %p940_p8  ;;  %s191_s6 = sshll.u32 %s863_s30, 4  ;;  %s192_s6 = int_to_ptr.vmem [resolvable:$true] %s191_s6 }
  0x11   : > { %p724_p13 = scmp.ne.s32.totalorder %s176_s28, %s723_s7  ;;  %p731_p5 = scmp.lt.s32.totalorder %s176_s28, %s176_s28 }
  0x12   : > { %p949_p11 = pnand %p641_p9, %p1093_p1  ;;  %p732_p7 = scmp.lt.s32.totalorder %s723_s7, %s723_s7 }
  0x14   : > { %p714_p12 = pneg %p949_p11  ;;  %p733_p10 = por %p732_p7, %p731_p5 }
  0x16   : > { %p726_p0 = pnand %p724_p13, %p714_p12 }
  0x18   : > { %p727_p3 = pneg %p726_p0 }
  0x1a   : > { %p734_p9 = pnand %p733_p10, %p727_p3 }
  0x1c   : > { %737 = shalt.err (!%p734_p9)
}
  0x1d   : > { %s864_s8 = smov 64   ;;  %s865_s9 = smov 4  }
  0x1e   : > { %644 = dma.hbm_to_vmem [thread:$0]  (!%p949_p11), %s1088_s1, 256, %s176_s28, [#allocation6], %s864_s8, %s864_s8, %s865_s9  }
  0x1f   : > { %s749_s12 = scalar_lea.vmem %s192_s6, 1024  ;;  %p757_p2 = scmp.lt.s32.totalorder %s192_s6, %s192_s6 }
  0x20   : > { %p750_p1 = scmp.ne.s32.totalorder %s192_s6, %s749_s12  ;;  %p758_p6 = scmp.lt.s32.totalorder %s749_s12, %s749_s12 }
  0x22   : > { %p752_p13 = pnand %p750_p1, %p714_p12  ;;  %p759_p5 = por %p758_p6, %p757_p2 }
  0x24   : > { %p753_p0 = pneg %p752_p13 }
  0x26   : > { %p760_p10 = pnand %p759_p5, %p753_p0 }
  0x28   : > { %763 = shalt.err (!%p760_p10)
}
  0x29   : > { %647 = dma.hbm_to_vmem [thread:$0]  (!%p949_p11), %s1090_s3, 1024, %s192_s6, [#allocation6], %s864_s8, %s864_s8, %s865_s9  }
  0x2a   : > { %s972_s15 = sadd.s32 1, %s860_s21   ;;  %s29_s16 = sadd.s32 1, %s856_s20 }
  0x2b   : > { %s26_s17 = ssub.s32 %s860_s21, %s972_s15  ;;  %p36_p1 = scmp.ne.s32.totalorder %s856_s20, %s852_s19 }
  0x2c   : > { %p27_p2 = scmp.eq.s32.totalorder %s26_s17, 0  ;;  %p37_p6 = scmp.eq.s32.totalorder %s860_s21, 0 }
  0x2d   : > { %p1101_p12 = scmp.eq.s32.totalorder %s921_s22, 1  ;;  %p658_p7 = scmp.lt.s32.totalorder %s860_s21, 2 }
  0x2e   : > { %s988_s27 = scalar_select %p27_p2, %s856_s20, %s29_s16  }
  0x2f   : > { %p982_p3 = por %p1101_p12, %p36_p1  ;;  %p38_p9 = por %p37_p6, %p36_p1 }
  0x30   : > { %s208_s28 = sand.u32 1, %s856_s20   ;;  %s566_s30 = sshll.u32 %s860_s21, 7 }
  0x31   : > { %s1102_s23 = scalar_select %p982_p3, 1, 0 }
  0x32   : > { %s565_s29 = sshll.u32 %s208_s28, 3  ;;  %s995_s8 = scalar_lea.hbm %s1087_s0, %s566_s30 }
  0x33   : > { %s212_s9 = scalar_lea.vmem [#allocation2], %s565_s29  ;;  %p997_p11 = pnand %p658_p7, %p38_p9 }
  0x34   : > { %s219_s10 = sshll.u32 %s212_s9, 4  ;;  %s209_s12 = scalar_lea.sflag [#allocation3], %s208_s28  ;;  %s220_s10 = int_to_ptr.vmem [resolvable:$true] %s219_s10 }
  0x35   : > { %s764_s13 = scalar_lea.hbm %s995_s8, 128  ;;  %p766_p0 = pneg %p997_p11 }
  0x36   : > { %p765_p13 = scmp.ne.s32.totalorder %s995_s8, %s764_s13  ;;  %s769_s17 = scalar_lea.hbm %s1087_s0, 256 }
  0x37   : > { %p770_p1 = scmp.lt.s32.totalorder %s995_s8, %s1087_s0  ;;  %p771_p2 = scmp.lt.s32.totalorder %s769_s17, %s764_s13 }
  0x38   : > { %p767_p5 = pnand %p766_p0, %p765_p13 }
  0x39   : > { %p772_p6 = por %p771_p2, %p770_p1 }
  0x3a   : > { %p768_p10 = pneg %p767_p5 }
  0x3c   : > { %p773_p12 = pnand %p772_p6, %p768_p10 }
  0x3e   : > { %776 = shalt.err (!%p773_p12)
}
  0x3f   : > { %s777_s6 = scalar_lea.vmem %s220_s10, 128  ;;  %s866_s28 = smov [#allocation2]  }
  0x40   : > { %p778_p7 = scmp.ne.s32.totalorder %s220_s10, %s777_s6  ;;  %s782_s7 = sshll.u32 %s866_s28, 4  ;;  %s783_s7 = int_to_ptr.vmem [resolvable:$false] %s782_s7 }
  0x41   : > { %s784_s9 = scalar_lea.vmem %s783_s7, 256  ;;  %p785_p13 = scmp.lt.s32.totalorder %s220_s10, %s783_s7 }
  0x42   : > { %p780_p9 = pnand %p778_p7, %p766_p0  ;;  %p786_p5 = scmp.lt.s32.totalorder %s784_s9, %s777_s6 }
  0x44   : > { %p781_p3 = pneg %p780_p9  ;;  %p787_p4 = por %p786_p5, %p785_p13 }
  0x46   : > { %p788_p8 = pnand %p787_p4, %p781_p3 }
  0x48   : > { %791 = shalt.err (!%p788_p8)
}
  0x49   : > { %651 = dma.hbm_to_vmem [thread:$0]  (!%p997_p11), %s995_s8, 128, %s220_s10, %s209_s12  }
  0x4a   : > { %p1104_p10 = scmp.ne.s32.totalorder %s1099_s26, 0 }
  0x4b   : > { %s1018_s13 = sand.u32 (!%p1104_p10), 1, %s852_s19   ;;  %p1105_p4 = scmp.ne.s32.totalorder (!%p1104_p10), %s1097_s24, 0 }
  0x4c   : > { %228 = sbr.rel (%p1104_p10) target bundleno = 521 (0x209), region = 40  ;;  %s568_s14 = sshll.u32 (!%p1104_p10), %s1018_s13, 3 }
  0x4d   : > { %s231_s16 = scalar_lea.sflag (!%p1104_p10), [#allocation3], %s1018_s13  ;;  %s234_s17 = scalar_lea.vmem (!%p1104_p10), [#allocation2], %s568_s14 }
  0x51   : > { %835 = dma.done.wait (%p1105_p4), %s231_s16, 128  }
  0x52   : > { %837 = vsyncadd (%p1105_p4), %s231_s16, 4294967168  ;;  %p1106_p8 = scmp.eq.s32.totalorder %s921_s22, 0 }
  0x54   : > { %839 = dma.done.wait (%p1106_p8), [#allocation6], 1280   ;;  %p1107_p3 = pmov %p1106_p8 }
  0x55   : > { %v867_v0 = vmov 0.0   ;;  %vm868_vm0 = vmmov 0   ;;  %v700_v1 = vld [vmem:[#allocation5 + $0x8] sm:$0xff]   ;;  %v701_v2 = vld [vmem:[#allocation5] sm:$0xff]   ;;  %v270_v3 = vld [vmem:[%s234_s17] sm:$0xff]  ;;  %vm295_vm1 = vcmask 261120  }
  0x56   : > { %841 = vsyncadd (%p1107_p3), [#allocation6], 4294966016  ;;  %601 = vmatprep.subr.bf16.mxu0 %v867_v0  ;;  %605 = vmatprep.mubr.msk.bf16.mxu0 %vm868_vm0, %v867_v0  ;;  %v702_v4 = vld [vmem:[#allocation7 + $0x38] sm:$0xff]   ;;  %v703_v5 = vld [vmem:[#allocation7 + $0x30] sm:$0xff]   ;;  %v271_v6 = vpack.c.bf16 %v270_v3, %v270_v3  ;;  %s586_s11 = sshll.u32 %s921_s22, 7  ;;  %s268_s12 = scalar_lea.vmem [#allocation8], %s568_s14 }
  0x57   : > { %609 = vmatprep.subr.bf16.mxu1 %v867_v0  ;;  %625 = vmatprep.mubr.msk.bf16.mxu1 %vm868_vm0, %v867_v0  ;;  %v704_v7 = vld [vmem:[#allocation7 + $0x28] sm:$0xff]   ;;  %v705_v8 = vld [vmem:[#allocation7 + $0x20] sm:$0xff]   ;;  %v706_v9 = vld [vmem:[#allocation7 + $0x18] sm:$0xff]   ;;  %s471_s30 = sshll.u32 %s268_s12, 4  ;;  %s1044_s28 = scalar_lea.hbm %s1092_s5, %s586_s11  ;;  %s1046_s30 = int_to_ptr.vmem [resolvable:$true] %s471_s30 }
  0x58   : > { %602 = vmatpush3.bf16.msra.mxu0 %v700_v1  ;;  %610 = vmatpush3.bf16.msra.mxu1 %v702_v4  ;;  %v707_v10 = vld [vmem:[#allocation7 + $0x10] sm:$0xff]   ;;  %v708_v11 = vld [vmem:[#allocation7 + $0x8] sm:$0xff]   ;;  %v709_v12 = vld [vmem:[#allocation7] sm:$0xff]   ;;  %s458_s7 = scalar_lea.sflag [#allocation4], %s1018_s13  ;;  %s792_s22 = scalar_lea.vmem %s1046_s30, 128 }
  0x59   : > { %603 = vmatprep.subr.bf16.mxu0 %v867_v0  ;;  %611 = vmatprep.subr.bf16.mxu1 %v867_v0  ;;  %v572_v13 = vld [vmem:[%s1089_s2] ss:$0 sm:$0xff]  ;;  %p793_p11 = scmp.ne.s32.totalorder %s1046_s30, %s792_s22  ;;  %p1108_p0 = scmp.ne.s32.totalorder %s1102_s23, 0 }
  0x5a   : > { %v576_v25 = vld [vmem:[%s1091_s4] ss:$0 sm:$0xff]  ;;  %s869_s9 = smov [#allocation8]  }
  0x5b   : > { %p794_p1 = pnand %p793_p11, %p1108_p0  ;;  %s796_s14 = sshll.u32 %s869_s9, 4  ;;  %s797_s14 = int_to_ptr.vmem [resolvable:$false] %s796_s14 }
  0x5c   : > { %604 = vmatpush3.bf16.msra.mxu0 %v701_v2  ;;  %612 = vmatpush3.bf16.msra.mxu1 %v703_v5  ;;  %s798_s16 = scalar_lea.vmem %s797_s14, 256  ;;  %p799_p6 = scmp.lt.s32.totalorder %s1046_s30, %s797_s14 }
  0x5d   : > { %613 = vmatprep.subr.bf16.mxu1 %v867_v0  ;;  %p795_p2 = pneg %p794_p1  ;;  %p800_p12 = scmp.lt.s32.totalorder %s798_s16, %s792_s22 }
  0x5f   : > { %606 = vmatmul.mubr.msk.bf16.vlgmr.msra.gmra.mxu0 %vm295_vm1, %v271_v6  ;;  %p801_p7 = por %p800_p12, %p799_p6 }
  0x60   : > { %614 = vmatpush3.bf16.msra.mxu1 %v704_v7 }
  0x61   : > { %615 = vmatprep.subr.bf16.mxu1 %v867_v0  ;;  %p802_p9 = pnand %p801_p7, %p795_p2 }
  0x64   : > { %616 = vmatpush3.bf16.msra.mxu1 %v705_v8 }
  0x65   : > { %617 = vmatprep.subr.bf16.mxu1 %v867_v0 }
  0x68   : > { %618 = vmatpush3.bf16.msra.mxu1 %v706_v9 }
  0x69   : > { %619 = vmatprep.subr.bf16.mxu1 %v867_v0 }
  0x6c   : > { %620 = vmatpush3.bf16.msra.mxu1 %v707_v10 }
  0x6d   : > { %621 = vmatprep.subr.bf16.mxu1 %v867_v0 }
  0x70   : > { %622 = vmatpush3.bf16.msra.mxu1 %v708_v11 }
  0x71   : > { %623 = vmatprep.subr.bf16.mxu1 %v867_v0 }
  0x74   : > { %624 = vmatpush3.bf16.msra.mxu1 %v709_v12 }
 0x11f   : > { %v333_v14 = vpop.f32.mrf.mxu0 }
 0x120   : > { %v334_v15 = vadd.f32 %v572_v13, %v333_v14 }
 0x121   : > { %v607_v16 = vpop.f32.mrf.mxu0 }
 0x122   : > { %v340_v17 = vmul.f32 0.70710677, %v334_v15  ;;  %v339_v21 = vmul.f32 0.5, %v334_v15 }
 0x123   : > { %v336_v18 = vpop.f32.mrf.mxu0 }
 0x124   : > { %710 = verf.f32 %v340_v17 }
 0x125   : > { %v608_v19 = vpop.f32.mrf.mxu0 }
 0x131   : > { %v711_v20 = vpop.eup %710 }
 0x132   : > { %v342_v22 = vadd.f32 1.0, %v711_v20 }
 0x134   : > { %v343_v23 = vmul.f32 %v342_v22, %v339_v21 }
 0x136   : > { %v344_v24 = vpack.c.bf16 %v343_v23, %v343_v23 }
 0x138   : > { %626 = vmatmul.mubr.bf16.vlgmr.msra.gmra.mxu1 %v344_v24 }
 0x1f8   : > { %v450_v26 = vpop.f32.mrf.mxu1 }
 0x1f9   : > { %v451_v27 = vadd.f32 %v576_v25, %v450_v26 }
 0x1fa   : > { %v627_v28 = vpop.f32.mrf.mxu1 }
 0x1fb   : > { %456 = vst [vmem:[%s268_s12] sm:$0xff] %v451_v27 }
 0x1fc   : > { %v453_v29 = vpop.f32.mrf.mxu1 }
 0x1fd   : > { %805 = shalt.err (!%p802_p9)
}
 0x1fe   : > { %s806_s17 = scalar_lea.hbm %s1044_s28, 128  ;;  %s810_s26 = scalar_lea.hbm %s1092_s5, 256 }
 0x1ff   : > { %p807_p13 = scmp.ne.s32.totalorder %s1044_s28, %s806_s17  ;;  %p811_p4 = scmp.lt.s32.totalorder %s1044_s28, %s1092_s5 }
 0x200   : > { %p812_p8 = scmp.lt.s32.totalorder %s810_s26, %s806_s17 }
 0x201   : > { %p808_p5 = pnand %p807_p13, %p1108_p0 }
 0x202   : > { %p813_p3 = por %p812_p8, %p811_p4 }
 0x203   : > { %p809_p10 = pneg %p808_p5 }
 0x205   : > { %p814_p11 = pnand %p813_p3, %p809_p10 }
 0x207   : > { %817 = shalt.err (!%p814_p11)
}
 0x208   : > { %639 = dma.vmem_to_hbm [thread:$0]  (%p1108_p0), %s1046_s30, 128, %s1044_s28, %s458_s7   ;;  %v628_v30 = vpop.f32.mrf.mxu1 }
 0x209 PF: > { %s483_s11 = sand.u32 1, %s848_s18   ;;  %p1109_p1 = scmp.ne.s32.totalorder %s1098_s25, 0 }
 0x20a   : > { %p1110_p2 = scmp.ge.s32.totalorder %s860_s21, 2  ;;  %s484_s12 = scalar_lea.sflag [#allocation4], %s483_s11 }
 0x20c   : > { %p653_p6 = pnand %p1110_p2, %p1109_p1 }
 0x20e   : > { %p654_p12 = pneg %p653_p6 }
 0x210   : > { %843 = dma.done.wait (%p654_p12), %s484_s12, 128  }
 0x211   : > { %845 = vsyncadd (%p654_p12), %s484_s12, 4294967168  ;;  %p19_p7 = scmp.ge.s32.totalorder %s972_s15, 4   ;;  %s1111_s18 = smov %s852_s19 }
 0x212   : > { %s1112_s19 = smov %s856_s20  ;;  %s1113_s20 = smov %s988_s27 }
 0x213   : > { %s1114_s21 = smov %s972_s15  ;;  %21 = sbr.rel (!%p19_p7) target bundleno = 6 (0x6), region = 93 }
 0x218   :  { %489 = vsyncpa [#allocation3], 1 }
 0x219   :  { %491 = vsyncpa [#allocation3 + $0x1], 1 }
 0x21a   :  { %492 = vsyncpa [#allocation6], 1 }
 0x21b   :  { %493 = vsyncpa [#allocation4], 1 }
 0x21c   :  { %495 = vsyncpa [#allocation4 + $0x1], 1 }

</bundles_post_ra>
